<compile_context>
chip_gen: v7x
topology: tpu7x:2x2x1
jax: 0.10.0
libtpu: 0.0.40
codegen_flags: <defaults>
</compile_context>

<pallas_src>
import functools

import jax
import jax.numpy as jnp
from jax.experimental import pallas as pl
from jax.experimental.pallas import tpu as pltpu


def _diffusion_kernel(a_ref, p_ref, mask_ref, out_ref, *, niter, n):
    # a_ref    : (N, N) f32  -- prob_matrix, UN-transposed (sublane=j, lane=i)
    # p_ref    : (N, 1) f32  -- initial preds as a column
    # mask_ref : (N, 1) f32  -- 1.0 at seed_idx positions
    p0 = p_ref[...]
    mask = mask_ref[...]

    q = n // 4  # power-of-two N >= 128 => q is a multiple of 8

    def body(_, p_col):
        # Fused first tree level (4:1 fan-in): q[j,i] = 1 - A[j,i]*p[j] is
        # folded straight into the product; the (N, N) temporary never exists.
        r = ((1.0 - a_ref[0 * q:1 * q, :] * p_col[0 * q:1 * q, :])
             * (1.0 - a_ref[1 * q:2 * q, :] * p_col[1 * q:2 * q, :])
             * (1.0 - a_ref[2 * q:3 * q, :] * p_col[2 * q:3 * q, :])
             * (1.0 - a_ref[3 * q:4 * q, :] * p_col[3 * q:4 * q, :]))  # (N/4, N)

        # Sublane-direction product tree down to 8 rows (4:1 where possible;
        # every slice start/size is a multiple of 8 -> pure VPU work).
        h = q
        while h > 8:
            if h % 4 == 0 and h // 4 >= 8:
                s = h // 4
                r = (r[0:s, :] * r[s:2 * s, :]) * (r[2 * s:3 * s, :] * r[3 * s:4 * s, :])
                h = s
            else:
                s = h // 2
                r = r[0:s, :] * r[s:2 * s, :]
                h = s

        # All-product over the remaining 8 sublanes: 3 intra-vreg rolls (XLU).
        for shift in (1, 2, 4):
            r = r * pltpu.roll(r, shift=shift, axis=0)
        # Every sublane of r now holds prod_j (1 - A[j,i]*p[j]), lane-indexed by i.

        # Tiny (8, N) -> (N, 8) relayout to bring the carry back to column
        # orientation for the next iteration (the N x N matrix is never moved).
        rt = jnp.transpose(r)                      # (N, 8), XLU (tiny)
        prod_col = rt[:, 0:1]                      # (N, 1)

        newp = 1.0 - prod_col
        # preds[seed_idx] = 1 : newp in [0, 1], mask in {0, 1} => max == clamp.
        return jnp.maximum(newp, mask)

    p_final = jax.lax.fori_loop(0, niter, body, p0, unroll=True)
    # preds = (preds + temp) / 2
    out_ref[...] = (p_final + p0) * 0.5


def diffusion_propagate(prob_matrix, preds, seed_idx, idx, niter):
    """Pallas implementation of DiffusionPropagate.forward."""
    n = prob_matrix.shape[0]
    assert prob_matrix.shape == (n, n)
    assert n >= 128 and (n & (n - 1)) == 0, "N must be a power of two >= 128"
    # TODO(synk): arbitrary N needs zero-padded columns (padded factors == 1.0)
    # plus row masking to be a drop-in replacement for the PyTorch op.

    a = jnp.asarray(prob_matrix, jnp.float32)                  # (N, N), NOT transposed
    p_col = jnp.asarray(preds, jnp.float32).reshape(n, 1)      # (N, 1)
    mask = (jnp.zeros((n,), jnp.float32)
            .at[jnp.asarray(seed_idx)].set(1.0)
            .reshape(n, 1))                                     # (N, 1)

    kernel = functools.partial(_diffusion_kernel, niter=niter, n=n)

    # Live set: resident A (4N^2) + fused first tree level (N^2) + columns +
    # headroom for rolls / the (8,N) transpose / vreg spills.
    budget = 5 * n * n + 64 * n + (1 << 20)
    try:
        vmem_cap = pltpu.get_tpu_info().vmem_capacity_bytes
    except Exception:
        vmem_cap = 64 * 1024 * 1024  # conservative fallback: v7x per-core VMEM
    assert budget <= vmem_cap, (
        "prob_matrix does not fit resident in VMEM; a row-tiled streaming "
        "grid is required for this N")
    vmem_limit = min(max(budget, 16 * 1024 * 1024), vmem_cap)

    out = pl.pallas_call(
        kernel,
        out_shape=jax.ShapeDtypeStruct((n, 1), jnp.float32),
        # No grid => whole arrays land in VMEM once (single-buffered, no
        # pipeline double-buffering of the dominant N x N operand).
        in_specs=[
            pl.BlockSpec(memory_space=pltpu.MemorySpace.VMEM),   # A
            pl.BlockSpec(memory_space=pltpu.MemorySpace.VMEM),   # preds column
            pl.BlockSpec(memory_space=pltpu.MemorySpace.VMEM),   # seed mask column
        ],
        out_specs=pl.BlockSpec(memory_space=pltpu.MemorySpace.VMEM),
        compiler_params=pltpu.CompilerParams(vmem_limit_bytes=vmem_limit),
    )(a, p_col, mask)

    # Final gather preds[idx] is glue (plain JAX).
    return out[jnp.asarray(idx), 0]


def diffusion_propagate_ref(prob_matrix, preds, seed_idx, idx, niter):
    """Pure-JAX reference mirroring the PyTorch forward."""
    prob_matrix = jnp.asarray(prob_matrix, jnp.float32)
    p = jnp.asarray(preds, jnp.float32)
    temp = p
    for _ in range(niter):
        P2 = prob_matrix.T * p[None, :]
        P3 = 1.0 - P2
        p = 1.0 - jnp.prod(P3, axis=1)
        p = p.at[jnp.asarray(seed_idx)].set(1.0)
    p = (p + temp) / 2.0
    return p[jnp.asarray(idx)]


if __name__ == "__main__":
    N = 128        # number of graph nodes (power of two, lane-aligned)
    NITER = 3      # diffusion iterations

    key = jax.random.PRNGKey(0)
    k_pm, k_pr = jax.random.split(key)

    # Deterministic synthetic "probability matrix" (dense, entries in [0, 0.3)).
    prob_matrix = jax.random.uniform(k_pm, (N, N), jnp.float32) * 0.3
    preds = jax.random.uniform(k_pr, (N,), jnp.float32)

    seed_idx = jnp.array([0, 5, 17, 42], dtype=jnp.int32)
    idx = jnp.arange(0, N, 7, dtype=jnp.int32)

    out = diffusion_propagate(prob_matrix, preds, seed_idx, idx, NITER)
    out = jax.block_until_ready(out)

    ref = diffusion_propagate_ref(prob_matrix, preds, seed_idx, idx, NITER)
    ref = jax.block_until_ready(ref)

    assert out.shape == ref.shape
    assert jnp.allclose(out, ref, atol=1e-5, rtol=1e-5), (out, ref)

    print("KERNEL_OK")
</pallas_src>

<mosaic_0001>
module attributes {stable_mosaic.version = 11 : i64} {
  func.func @_diffusion_kernel(%arg0: memref<128x128xf32, #tpu.memory_space<vmem>>, %arg1: memref<128x1xf32, #tpu.memory_space<vmem>>, %arg2: memref<128x1xf32, #tpu.memory_space<vmem>>, %arg3: memref<128x1xf32, #tpu.memory_space<vmem>>) attributes {dimension_semantics = [], scalar_prefetch = 0 : i64, scratch_operands = 0 : i64, tpu.core_type = #tpu.core_type<tc>} {
    %c0 = arith.constant 0 : index
    %c0_0 = arith.constant 0 : index
    %0 = vector.load %arg1[%c0, %c0_0] : memref<128x1xf32, #tpu.memory_space<vmem>>, vector<128x1xf32>
    %c0_1 = arith.constant 0 : index
    %c0_2 = arith.constant 0 : index
    %1 = vector.load %arg2[%c0_1, %c0_2] : memref<128x1xf32, #tpu.memory_space<vmem>>, vector<128x1xf32>
    %c0_i32 = arith.constant 0 : i32
    %c0_3 = arith.constant 0 : index
    %c0_4 = arith.constant 0 : index
    %2 = vector.load %arg0[%c0_3, %c0_4] : memref<128x128xf32, #tpu.memory_space<vmem>>, vector<32x128xf32>
    %3 = vector.extract_strided_slice %0 {offsets = [0, 0], sizes = [32, 1], strides = [1, 1]} : vector<128x1xf32> to vector<32x1xf32>
    %4 = vector.broadcast %3 : vector<32x1xf32> to vector<32x128xf32>
    %5 = arith.mulf %2, %4 : vector<32x128xf32>
    %cst = arith.constant 1.000000e+00 : f32
    %6 = vector.broadcast %cst : f32 to vector<32x128xf32>
    %7 = arith.subf %6, %5 : vector<32x128xf32>
    %c32 = arith.constant 32 : index
    %c0_5 = arith.constant 0 : index
    %8 = vector.load %arg0[%c32, %c0_5] : memref<128x128xf32, #tpu.memory_space<vmem>>, vector<32x128xf32>
    %9 = vector.extract_strided_slice %0 {offsets = [32, 0], sizes = [32, 1], strides = [1, 1]} : vector<128x1xf32> to vector<32x1xf32>
    %10 = vector.broadcast %9 : vector<32x1xf32> to vector<32x128xf32>
    %11 = arith.mulf %8, %10 : vector<32x128xf32>
    %cst_6 = arith.constant 1.000000e+00 : f32
    %12 = vector.broadcast %cst_6 : f32 to vector<32x128xf32>
    %13 = arith.subf %12, %11 : vector<32x128xf32>
    %14 = arith.mulf %7, %13 : vector<32x128xf32>
    %c64 = arith.constant 64 : index
    %c0_7 = arith.constant 0 : index
    %15 = vector.load %arg0[%c64, %c0_7] : memref<128x128xf32, #tpu.memory_space<vmem>>, vector<32x128xf32>
    %16 = vector.extract_strided_slice %0 {offsets = [64, 0], sizes = [32, 1], strides = [1, 1]} : vector<128x1xf32> to vector<32x1xf32>
    %17 = vector.broadcast %16 : vector<32x1xf32> to vector<32x128xf32>
    %18 = arith.mulf %15, %17 : vector<32x128xf32>
    %cst_8 = arith.constant 1.000000e+00 : f32
    %19 = vector.broadcast %cst_8 : f32 to vector<32x128xf32>
    %20 = arith.subf %19, %18 : vector<32x128xf32>
    %21 = arith.mulf %14, %20 : vector<32x128xf32>
    %c96 = arith.constant 96 : index
    %c0_9 = arith.constant 0 : index
    %22 = vector.load %arg0[%c96, %c0_9] : memref<128x128xf32, #tpu.memory_space<vmem>>, vector<32x128xf32>
    %23 = vector.extract_strided_slice %0 {offsets = [96, 0], sizes = [32, 1], strides = [1, 1]} : vector<128x1xf32> to vector<32x1xf32>
    %24 = vector.broadcast %23 : vector<32x1xf32> to vector<32x128xf32>
    %25 = arith.mulf %22, %24 : vector<32x128xf32>
    %cst_10 = arith.constant 1.000000e+00 : f32
    %26 = vector.broadcast %cst_10 : f32 to vector<32x128xf32>
    %27 = arith.subf %26, %25 : vector<32x128xf32>
    %28 = arith.mulf %21, %27 : vector<32x128xf32>
    %29 = vector.extract_strided_slice %28 {offsets = [0, 0], sizes = [8, 128], strides = [1, 1]} : vector<32x128xf32> to vector<8x128xf32>
    %30 = vector.extract_strided_slice %28 {offsets = [8, 0], sizes = [8, 128], strides = [1, 1]} : vector<32x128xf32> to vector<8x128xf32>
    %31 = arith.mulf %29, %30 : vector<8x128xf32>
    %32 = vector.extract_strided_slice %28 {offsets = [16, 0], sizes = [8, 128], strides = [1, 1]} : vector<32x128xf32> to vector<8x128xf32>
    %33 = vector.extract_strided_slice %28 {offsets = [24, 0], sizes = [8, 128], strides = [1, 1]} : vector<32x128xf32> to vector<8x128xf32>
    %34 = arith.mulf %32, %33 : vector<8x128xf32>
    %35 = arith.mulf %31, %34 : vector<8x128xf32>
    %c1_i32 = arith.constant 1 : i32
    %36 = tpu.dynamic_rotate %35 by %c1_i32 dim 0 : vector<8x128xf32>, i32 -> vector<8x128xf32>
    %37 = arith.mulf %35, %36 : vector<8x128xf32>
    %c2_i32 = arith.constant 2 : i32
    %38 = tpu.dynamic_rotate %37 by %c2_i32 dim 0 : vector<8x128xf32>, i32 -> vector<8x128xf32>
    %39 = arith.mulf %37, %38 : vector<8x128xf32>
    %c4_i32 = arith.constant 4 : i32
    %40 = tpu.dynamic_rotate %39 by %c4_i32 dim 0 : vector<8x128xf32>, i32 -> vector<8x128xf32>
    %41 = arith.mulf %39, %40 : vector<8x128xf32>
    %42 = tpu.transpose %41, [1, 0] : vector<8x128xf32> -> vector<128x8xf32>
    %43 = vector.extract_strided_slice %42 {offsets = [0, 0], sizes = [128, 1], strides = [1, 1]} : vector<128x8xf32> to vector<128x1xf32>
    %cst_11 = arith.constant 1.000000e+00 : f32
    %44 = vector.broadcast %cst_11 : f32 to vector<128x1xf32>
    %45 = arith.subf %44, %43 : vector<128x1xf32>
    %46 = arith.maximumf %45, %1 : vector<128x1xf32>
    %c1_i32_12 = arith.constant 1 : i32
    %c0_13 = arith.constant 0 : index
    %c0_14 = arith.constant 0 : index
    %47 = vector.load %arg0[%c0_13, %c0_14] : memref<128x128xf32, #tpu.memory_space<vmem>>, vector<32x128xf32>
    %48 = vector.extract_strided_slice %46 {offsets = [0, 0], sizes = [32, 1], strides = [1, 1]} : vector<128x1xf32> to vector<32x1xf32>
    %49 = vector.broadcast %48 : vector<32x1xf32> to vector<32x128xf32>
    %50 = arith.mulf %47, %49 : vector<32x128xf32>
    %cst_15 = arith.constant 1.000000e+00 : f32
    %51 = vector.broadcast %cst_15 : f32 to vector<32x128xf32>
    %52 = arith.subf %51, %50 : vector<32x128xf32>
    %c32_16 = arith.constant 32 : index
    %c0_17 = arith.constant 0 : index
    %53 = vector.load %arg0[%c32_16, %c0_17] : memref<128x128xf32, #tpu.memory_space<vmem>>, vector<32x128xf32>
    %54 = vector.extract_strided_slice %46 {offsets = [32, 0], sizes = [32, 1], strides = [1, 1]} : vector<128x1xf32> to vector<32x1xf32>
    %55 = vector.broadcast %54 : vector<32x1xf32> to vector<32x128xf32>
    %56 = arith.mulf %53, %55 : vector<32x128xf32>
    %cst_18 = arith.constant 1.000000e+00 : f32
    %57 = vector.broadcast %cst_18 : f32 to vector<32x128xf32>
    %58 = arith.subf %57, %56 : vector<32x128xf32>
    %59 = arith.mulf %52, %58 : vector<32x128xf32>
    %c64_19 = arith.constant 64 : index
    %c0_20 = arith.constant 0 : index
    %60 = vector.load %arg0[%c64_19, %c0_20] : memref<128x128xf32, #tpu.memory_space<vmem>>, vector<32x128xf32>
    %61 = vector.extract_strided_slice %46 {offsets = [64, 0], sizes = [32, 1], strides = [1, 1]} : vector<128x1xf32> to vector<32x1xf32>
    %62 = vector.broadcast %61 : vector<32x1xf32> to vector<32x128xf32>
    %63 = arith.mulf %60, %62 : vector<32x128xf32>
    %cst_21 = arith.constant 1.000000e+00 : f32
    %64 = vector.broadcast %cst_21 : f32 to vector<32x128xf32>
    %65 = arith.subf %64, %63 : vector<32x128xf32>
    %66 = arith.mulf %59, %65 : vector<32x128xf32>
    %c96_22 = arith.constant 96 : index
    %c0_23 = arith.constant 0 : index
    %67 = vector.load %arg0[%c96_22, %c0_23] : memref<128x128xf32, #tpu.memory_space<vmem>>, vector<32x128xf32>
    %68 = vector.extract_strided_slice %46 {offsets = [96, 0], sizes = [32, 1], strides = [1, 1]} : vector<128x1xf32> to vector<32x1xf32>
    %69 = vector.broadcast %68 : vector<32x1xf32> to vector<32x128xf32>
    %70 = arith.mulf %67, %69 : vector<32x128xf32>
    %cst_24 = arith.constant 1.000000e+00 : f32
    %71 = vector.broadcast %cst_24 : f32 to vector<32x128xf32>
    %72 = arith.subf %71, %70 : vector<32x128xf32>
    %73 = arith.mulf %66, %72 : vector<32x128xf32>
    %74 = vector.extract_strided_slice %73 {offsets = [0, 0], sizes = [8, 128], strides = [1, 1]} : vector<32x128xf32> to vector<8x128xf32>
    %75 = vector.extract_strided_slice %73 {offsets = [8, 0], sizes = [8, 128], strides = [1, 1]} : vector<32x128xf32> to vector<8x128xf32>
    %76 = arith.mulf %74, %75 : vector<8x128xf32>
    %77 = vector.extract_strided_slice %73 {offsets = [16, 0], sizes = [8, 128], strides = [1, 1]} : vector<32x128xf32> to vector<8x128xf32>
    %78 = vector.extract_strided_slice %73 {offsets = [24, 0], sizes = [8, 128], strides = [1, 1]} : vector<32x128xf32> to vector<8x128xf32>
    %79 = arith.mulf %77, %78 : vector<8x128xf32>
    %80 = arith.mulf %76, %79 : vector<8x128xf32>
    %c1_i32_25 = arith.constant 1 : i32
    %81 = tpu.dynamic_rotate %80 by %c1_i32_25 dim 0 : vector<8x128xf32>, i32 -> vector<8x128xf32>
    %82 = arith.mulf %80, %81 : vector<8x128xf32>
    %c2_i32_26 = arith.constant 2 : i32
    %83 = tpu.dynamic_rotate %82 by %c2_i32_26 dim 0 : vector<8x128xf32>, i32 -> vector<8x128xf32>
    %84 = arith.mulf %82, %83 : vector<8x128xf32>
    %c4_i32_27 = arith.constant 4 : i32
    %85 = tpu.dynamic_rotate %84 by %c4_i32_27 dim 0 : vector<8x128xf32>, i32 -> vector<8x128xf32>
    %86 = arith.mulf %84, %85 : vector<8x128xf32>
    %87 = tpu.transpose %86, [1, 0] : vector<8x128xf32> -> vector<128x8xf32>
    %88 = vector.extract_strided_slice %87 {offsets = [0, 0], sizes = [128, 1], strides = [1, 1]} : vector<128x8xf32> to vector<128x1xf32>
    %cst_28 = arith.constant 1.000000e+00 : f32
    %89 = vector.broadcast %cst_28 : f32 to vector<128x1xf32>
    %90 = arith.subf %89, %88 : vector<128x1xf32>
    %91 = arith.maximumf %90, %1 : vector<128x1xf32>
    %c2_i32_29 = arith.constant 2 : i32
    %c0_30 = arith.constant 0 : index
    %c0_31 = arith.constant 0 : index
    %92 = vector.load %arg0[%c0_30, %c0_31] : memref<128x128xf32, #tpu.memory_space<vmem>>, vector<32x128xf32>
    %93 = vector.extract_strided_slice %91 {offsets = [0, 0], sizes = [32, 1], strides = [1, 1]} : vector<128x1xf32> to vector<32x1xf32>
    %94 = vector.broadcast %93 : vector<32x1xf32> to vector<32x128xf32>
    %95 = arith.mulf %92, %94 : vector<32x128xf32>
    %cst_32 = arith.constant 1.000000e+00 : f32
    %96 = vector.broadcast %cst_32 : f32 to vector<32x128xf32>
    %97 = arith.subf %96, %95 : vector<32x128xf32>
    %c32_33 = arith.constant 32 : index
    %c0_34 = arith.constant 0 : index
    %98 = vector.load %arg0[%c32_33, %c0_34] : memref<128x128xf32, #tpu.memory_space<vmem>>, vector<32x128xf32>
    %99 = vector.extract_strided_slice %91 {offsets = [32, 0], sizes = [32, 1], strides = [1, 1]} : vector<128x1xf32> to vector<32x1xf32>
    %100 = vector.broadcast %99 : vector<32x1xf32> to vector<32x128xf32>
    %101 = arith.mulf %98, %100 : vector<32x128xf32>
    %cst_35 = arith.constant 1.000000e+00 : f32
    %102 = vector.broadcast %cst_35 : f32 to vector<32x128xf32>
    %103 = arith.subf %102, %101 : vector<32x128xf32>
    %104 = arith.mulf %97, %103 : vector<32x128xf32>
    %c64_36 = arith.constant 64 : index
    %c0_37 = arith.constant 0 : index
    %105 = vector.load %arg0[%c64_36, %c0_37] : memref<128x128xf32, #tpu.memory_space<vmem>>, vector<32x128xf32>
    %106 = vector.extract_strided_slice %91 {offsets = [64, 0], sizes = [32, 1], strides = [1, 1]} : vector<128x1xf32> to vector<32x1xf32>
    %107 = vector.broadcast %106 : vector<32x1xf32> to vector<32x128xf32>
    %108 = arith.mulf %105, %107 : vector<32x128xf32>
    %cst_38 = arith.constant 1.000000e+00 : f32
    %109 = vector.broadcast %cst_38 : f32 to vector<32x128xf32>
    %110 = arith.subf %109, %108 : vector<32x128xf32>
    %111 = arith.mulf %104, %110 : vector<32x128xf32>
    %c96_39 = arith.constant 96 : index
    %c0_40 = arith.constant 0 : index
    %112 = vector.load %arg0[%c96_39, %c0_40] : memref<128x128xf32, #tpu.memory_space<vmem>>, vector<32x128xf32>
    %113 = vector.extract_strided_slice %91 {offsets = [96, 0], sizes = [32, 1], strides = [1, 1]} : vector<128x1xf32> to vector<32x1xf32>
    %114 = vector.broadcast %113 : vector<32x1xf32> to vector<32x128xf32>
    %115 = arith.mulf %112, %114 : vector<32x128xf32>
    %cst_41 = arith.constant 1.000000e+00 : f32
    %116 = vector.broadcast %cst_41 : f32 to vector<32x128xf32>
    %117 = arith.subf %116, %115 : vector<32x128xf32>
    %118 = arith.mulf %111, %117 : vector<32x128xf32>
    %119 = vector.extract_strided_slice %118 {offsets = [0, 0], sizes = [8, 128], strides = [1, 1]} : vector<32x128xf32> to vector<8x128xf32>
    %120 = vector.extract_strided_slice %118 {offsets = [8, 0], sizes = [8, 128], strides = [1, 1]} : vector<32x128xf32> to vector<8x128xf32>
    %121 = arith.mulf %119, %120 : vector<8x128xf32>
    %122 = vector.extract_strided_slice %118 {offsets = [16, 0], sizes = [8, 128], strides = [1, 1]} : vector<32x128xf32> to vector<8x128xf32>
    %123 = vector.extract_strided_slice %118 {offsets = [24, 0], sizes = [8, 128], strides = [1, 1]} : vector<32x128xf32> to vector<8x128xf32>
    %124 = arith.mulf %122, %123 : vector<8x128xf32>
    %125 = arith.mulf %121, %124 : vector<8x128xf32>
    %c1_i32_42 = arith.constant 1 : i32
    %126 = tpu.dynamic_rotate %125 by %c1_i32_42 dim 0 : vector<8x128xf32>, i32 -> vector<8x128xf32>
    %127 = arith.mulf %125, %126 : vector<8x128xf32>
    %c2_i32_43 = arith.constant 2 : i32
    %128 = tpu.dynamic_rotate %127 by %c2_i32_43 dim 0 : vector<8x128xf32>, i32 -> vector<8x128xf32>
    %129 = arith.mulf %127, %128 : vector<8x128xf32>
    %c4_i32_44 = arith.constant 4 : i32
    %130 = tpu.dynamic_rotate %129 by %c4_i32_44 dim 0 : vector<8x128xf32>, i32 -> vector<8x128xf32>
    %131 = arith.mulf %129, %130 : vector<8x128xf32>
    %132 = tpu.transpose %131, [1, 0] : vector<8x128xf32> -> vector<128x8xf32>
    %133 = vector.extract_strided_slice %132 {offsets = [0, 0], sizes = [128, 1], strides = [1, 1]} : vector<128x8xf32> to vector<128x1xf32>
    %cst_45 = arith.constant 1.000000e+00 : f32
    %134 = vector.broadcast %cst_45 : f32 to vector<128x1xf32>
    %135 = arith.subf %134, %133 : vector<128x1xf32>
    %136 = arith.maximumf %135, %1 : vector<128x1xf32>
    %137 = arith.addf %136, %0 : vector<128x1xf32>
    %cst_46 = arith.constant 5.000000e-01 : f32
    %138 = vector.broadcast %cst_46 : f32 to vector<128x1xf32>
    %139 = arith.mulf %137, %138 : vector<128x1xf32>
    %c0_47 = arith.constant 0 : index
    %c0_48 = arith.constant 0 : index
    %140 = vector.load %arg3[%c0_47, %c0_48] : memref<128x1xf32, #tpu.memory_space<vmem>>, vector<128x1xf32>
    tpu.vector_store %arg3[%c0_47, %c0_48], %139 {strides = array<i32>} : memref<128x1xf32, #tpu.memory_space<vmem>>, vector<128x1xf32>,
    return
  }
}

</mosaic_0001>

<bundles_post_ra>
// kernel: tpu_custom_call.1
= control target key start
LH: loop header
LB: loop body
LE: loop exit
PB: predicated region body
PF: predicated region fallthrough
CT: control target
= control target key end

     0   :  { %v710_v0 = vmov 0   ;;  %vm685_vm0 = vcmask 7168   ;;  %s1163_s1 = inlined_call_operand.vmem [shape: f32[128,1], index: 1, kind: input, shape index: {}]   ;;  %s1164_s0 = inlined_call_operand.vmem [shape: f32[128,128], index: 0, kind: input, shape index: {}]   ;;  %s1165_s2 = inlined_call_operand.vmem [shape: f32[128,1], index: 2, kind: input, shape index: {}]   ;;  %s1166_s3 = inlined_call_operand.vmem [shape: f32[128,1], index: 3, kind: output, shape index: {}]  }
   0x1   :  { %709 = vset.pattern.permute.xlu1 %v710_v0  ;;  %708 = vset.pattern.permute.xlu0 %v710_v0  ;;  %v734_v1 = vld [vmem:[%s1163_s1 + $0x10] sm:$0xff]  ;;  %v739_v2 = vld [vmem:[%s1163_s1] sm:$0xff]  ;;  %v746_v3 = vld [vmem:[%s1163_s1 + $0x18] sm:$0xff] }
   0x2   :  { %1185 = vst [vmem:[#allocation2_spill] sm:$0xff] %v734_v1  ;;  %1186 = vst [vmem:[#allocation3_spill] sm:$0xff] %v739_v2  ;;  %62 = vperm.xlu1 %709, %v734_v1   ;;  %52 = vperm.xlu0 %708, %v739_v2   ;;  %v751_v4 = vld [vmem:[%s1163_s1 + $0x8] sm:$0xff]  ;;  %v763_v6 = vld [vmem:[%s1163_s1 + $0x20] sm:$0xff] }
   0x3   :  { %1187 = vst [vmem:[#allocation4_spill] sm:$0xff] %v746_v3  ;;  %1188 = vst [vmem:[#allocation5_spill] sm:$0xff] %v751_v4  ;;  %v758_v5 = vld [vmem:[%s1163_s1 + $0x28] sm:$0xff]  ;;  %v770_v7 = vld [vmem:[%s1163_s1 + $0x38] sm:$0xff] }
   0x4   :  { %1189 = vst [vmem:[#allocation6_spill] sm:$0xff] %v758_v5  ;;  %1190 = vst [vmem:[#allocation7_spill] sm:$0xff] %v763_v6  ;;  %v775_v8 = vld [vmem:[%s1163_s1 + $0x30] sm:$0xff]  ;;  %v782_v9 = vld [vmem:[%s1163_s1 + $0x48] sm:$0xff] }
   0x5   :  { %1191 = vst [vmem:[#allocation8_spill] sm:$0xff] %v770_v7  ;;  %1192 = vst [vmem:[#allocation9_spill] sm:$0xff] %v775_v8  ;;  %v787_v10 = vld [vmem:[%s1163_s1 + $0x40] sm:$0xff]  ;;  %v794_v11 = vld [vmem:[%s1163_s1 + $0x58] sm:$0xff] }
   0x6   :  { %67 = vperm.xlu1 %709, %v746_v3   ;;  %57 = vperm.xlu0 %708, %v751_v4   ;;  %1193 = vst [vmem:[#allocation10_spill] sm:$0xff] %v782_v9  ;;  %1194 = vst [vmem:[#allocation11_spill] sm:$0xff] %v787_v10  ;;  %v799_v12 = vld [vmem:[%s1163_s1 + $0x50] sm:$0xff]  ;;  %v806_v13 = vld [vmem:[%s1163_s1 + $0x68] sm:$0xff] }
   0x7   :  { %1195 = vst [vmem:[#allocation12_spill] sm:$0xff] %v794_v11  ;;  %1196 = vst [vmem:[#allocation13_spill] sm:$0xff] %v799_v12  ;;  %v811_v14 = vld [vmem:[%s1163_s1 + $0x60] sm:$0xff]  ;;  %v818_v15 = vld [vmem:[%s1163_s1 + $0x78] sm:$0xff] }
   0x8   :  { %1197 = vst [vmem:[#allocation14_spill] sm:$0xff] %v806_v13  ;;  %1198 = vst [vmem:[#allocation15_spill] sm:$0xff] %v811_v14  ;;  %v823_v16 = vld [vmem:[%s1163_s1 + $0x70] sm:$0xff]  ;;  %v830_v25 = vld [vmem:[%s1164_s0] sm:$0xff] }
   0x9   :  { %1199 = vst [vmem:[#allocation16_spill] sm:$0xff] %v818_v15  ;;  %1200 = vst [vmem:[#allocation17_spill] sm:$0xff] %v823_v16  ;;  %v835_v26 = vld [vmem:[%s1164_s0 + $0x28] sm:$0xff]  ;;  %v840_v27 = vld [vmem:[%s1164_s0 + $0x20] sm:$0xff] }
   0xa   :  { %89 = vperm.xlu1 %709, %v758_v5   ;;  %84 = vperm.xlu0 %708, %v763_v6   ;;  %v845_v30 = vld [vmem:[%s1164_s0 + $0x8] sm:$0xff]  ;;  %v850_v31 = vld [vmem:[%s1164_s0 + $0x38] sm:$0xff]  ;;  %v855_v32 = vld [vmem:[%s1164_s0 + $0x30] sm:$0xff] }
   0xb   :  { %v860_v33 = vld [vmem:[%s1164_s0 + $0x10] sm:$0xff]  ;;  %v865_v34 = vld [vmem:[%s1164_s0 + $0x48] sm:$0xff]  ;;  %v870_v35 = vld [vmem:[%s1164_s0 + $0x40] sm:$0xff] }
   0xc   :  { %v875_v36 = vld [vmem:[%s1164_s0 + $0x18] sm:$0xff]  ;;  %v887_v40 = vld [vmem:[%s1164_s0 + $0x50] sm:$0xff]  ;;  %v902_v53 = vld [vmem:[%s1164_s0 + $0x68] sm:$0xff] }
   0xd   :  { %v882_v39 = vld [vmem:[%s1164_s0 + $0x58] sm:$0xff]  ;;  %1201 = vst [vmem:[#allocation18_spill] sm:$0xff] %v902_v53  ;;  %v907_v54 = vld [vmem:[%s1164_s0 + $0x60] sm:$0xff] }
   0xe   :  { %99 = vperm.xlu1 %709, %v770_v7   ;;  %94 = vperm.xlu0 %708, %v775_v8   ;;  %1202 = vst [vmem:[#allocation19_spill] sm:$0xff] %v907_v54 }
  0x12   :  { %125 = vperm.xlu1 %709, %v782_v9   ;;  %120 = vperm.xlu0 %708, %v787_v10  }
  0x16   :  { %135 = vperm.xlu1 %709, %v794_v11   ;;  %130 = vperm.xlu0 %708, %v799_v12  }
  0x1a   :  { %161 = vperm.xlu1 %709, %v806_v13   ;;  %156 = vperm.xlu0 %708, %v811_v14  }
  0x1e   :  { %171 = vperm.xlu1 %709, %v818_v15   ;;  %166 = vperm.xlu0 %708, %v823_v16  }
  0x81   :  { %v63_v17 = vpop.permute.xlu1 %62  ;;  %v53_v18 = vpop.permute.xlu0 %52 }
  0x82   :  { %v70_v41 = vmul.f32 %v53_v18, %v830_v25  ;;  %v72_v49 = vmul.f32 %v63_v17, %v860_v33 }
  0x84   :  { %v74_v57 = vsub.f32 1.0, %v70_v41 }
  0x85   :  { %v68_v19 = vpop.permute.xlu1 %67  ;;  %v58_v20 = vpop.permute.xlu0 %57 }
  0x86   :  { %v71_v42 = vmul.f32 %v58_v20, %v845_v30  ;;  %v73_v50 = vmul.f32 %v68_v19, %v875_v36  ;;  %v76_v19 = vsub.f32 1.0, %v72_v49 }
  0x88   :  { %v75_v58 = vsub.f32 1.0, %v71_v42  ;;  %v77_v20 = vsub.f32 1.0, %v73_v50 }
  0x89   :  { %v90_v21 = vpop.permute.xlu1 %89  ;;  %v85_v22 = vpop.permute.xlu0 %84 }
  0x8a   :  { %v103_v37 = vmul.f32 %v90_v21, %v835_v26  ;;  %v102_v38 = vmul.f32 %v85_v22, %v840_v27 }
  0x8c   :  { %v107_v55 = vsub.f32 1.0, %v103_v37  ;;  %v106_v56 = vsub.f32 1.0, %v102_v38 }
  0x8d   :  { %v100_v23 = vpop.permute.xlu1 %99  ;;  %v95_v24 = vpop.permute.xlu0 %94 }
  0x8e   :  { %v105_v43 = vmul.f32 %v100_v23, %v850_v31  ;;  %v104_v44 = vmul.f32 %v95_v24, %v855_v32  ;;  %v914_v23 = vld [vmem:[%s1164_s0 + $0x78] sm:$0xff]  ;;  %v919_v24 = vld [vmem:[%s1164_s0 + $0x70] sm:$0xff] }
  0x90   :  { %v109_v59 = vsub.f32 1.0, %v105_v43  ;;  %v108_v60 = vsub.f32 1.0, %v104_v44 }
  0x91   :  { %v126_v28 = vpop.permute.xlu1 %125  ;;  %v121_v29 = vpop.permute.xlu0 %120 }
  0x92   :  { %v139_v47 = vmul.f32 %v126_v28, %v865_v34  ;;  %v138_v48 = vmul.f32 %v121_v29, %v870_v35  ;;  %v111_v28 = vmul.f32 %v107_v55, %v75_v58  ;;  %v110_v29 = vmul.f32 %v106_v56, %v74_v57 }
  0x93   :  { %v113_v41 = vmul.f32 %v109_v59, %v77_v20  ;;  %v112_v42 = vmul.f32 %v108_v60, %v76_v19  ;;  %v926_v20 = vld [vmem:[%s1165_s2] sm:$0xff] }
  0x94   :  { %v143_v63 = vsub.f32 1.0, %v139_v47  ;;  %v142_v0 = vsub.f32 1.0, %v138_v48 }
  0x95   :  { %v136_v45 = vpop.permute.xlu1 %135  ;;  %v131_v46 = vpop.permute.xlu0 %130 }
  0x96   :  { %v141_v51 = vmul.f32 %v136_v45, %v882_v39  ;;  %v140_v52 = vmul.f32 %v131_v46, %v887_v40  ;;  %v147_v45 = vmul.f32 %v143_v63, %v111_v28  ;;  %v146_v46 = vmul.f32 %v142_v0, %v110_v29  ;;  %v932_v29 = vld [vmem:[%s1165_s2 + $0x8] sm:$0xff] }
  0x98   :  { %v145_v21 = vsub.f32 1.0, %v141_v51  ;;  %v144_v22 = vsub.f32 1.0, %v140_v52 }
  0x99   :  { %v162_v61 = vpop.permute.xlu1 %161  ;;  %v157_v62 = vpop.permute.xlu0 %156 }
  0x9a   :  { %v175_v17 = vmul.f32 %v162_v61, %v902_v53  ;;  %v174_v18 = vmul.f32 %v157_v62, %v907_v54  ;;  %v149_v49 = vmul.f32 %v145_v21, %v113_v41  ;;  %v148_v50 = vmul.f32 %v144_v22, %v112_v42  ;;  %v938_v42 = vld [vmem:[%s1165_s2 + $0x10] sm:$0xff] }
  0x9c   :  { %v179_v37 = vsub.f32 1.0, %v175_v17  ;;  %v178_v38 = vsub.f32 1.0, %v174_v18 }
  0x9d   :  { %v172_v43 = vpop.permute.xlu1 %171  ;;  %v167_v44 = vpop.permute.xlu0 %166 }
  0x9e   :  { %v177_v47 = vmul.f32 %v172_v43, %v914_v23  ;;  %v176_v48 = vmul.f32 %v167_v44, %v919_v24  ;;  %v183_v51 = vmul.f32 %v179_v37, %v147_v45  ;;  %v182_v52 = vmul.f32 %v178_v38, %v146_v46  ;;  %v944_v46 = vld [vmem:[%s1165_s2 + $0x18] sm:$0xff] }
  0xa0   :  { %v181_v61 = vsub.f32 1.0, %v177_v47  ;;  %v180_v62 = vsub.f32 1.0, %v176_v48  ;;  %v186_v57 = vmul.f32 %v183_v51, %v182_v52 }
  0xa2   :  { %v185_v55 = vmul.f32 %v181_v61, %v149_v49  ;;  %v184_v56 = vmul.f32 %v180_v62, %v148_v50  ;;  %v950_v50 = vld [vmem:[%s1165_s2 + $0x20] sm:$0xff]  ;;  %v956_v62 = vld [vmem:[%s1165_s2 + $0x28] sm:$0xff] }
  0xa4   :  { %v187_v58 = vmul.f32 %v185_v55, %v184_v56 }
  0xa6   :  { %v188_v59 = vmul.f32 %v187_v58, %v186_v57  ;;  %v962_v58 = vld [vmem:[%s1165_s2 + $0x30] sm:$0xff] }
  0xa8   :  { %v189_v60 = vrot.slane %v188_v59, 7 }
  0xaa   :  { %v190_v17 = vmul.f32 %v189_v60, %v188_v59 }
  0xac   :  { %v191_v18 = vrot.slane %v190_v17, 6 }
  0xae   :  { %v192_v63 = vmul.f32 %v191_v18, %v190_v17  ;;  %v968_v18 = vld [vmem:[%s1165_s2 + $0x38] sm:$0xff] }
  0xb0   :  { %v193_v0 = vrot.slane %v192_v63, 4 }
  0xb2   :  { %v194_v19 = vmul.f32 %v193_v0, %v192_v63 }
  0xb4   :  { %195 = vxpose.xlu0.b32.start.end [1/1] (short) %v194_v19, 128 }
 0x134   :  { %v211_v21 = vpop.trf.xlu0 }
 0x135   :  { %v227_v22 = vsub.f32 1.0, %v211_v21  ;;  %v974_v21 = vld [vmem:[%s1165_s2 + $0x40] sm:$0xff] }
 0x137   :  { %v243_v28 = vmax.f32 %v227_v22, %v926_v20 }
 0x138   :  { %v212_v37 = vpop.trf.xlu0 }
 0x139   :  { %v228_v38 = vsub.f32 1.0, %v212_v37  ;;  %261 = vperm.xlu1 %709, %v243_v28  }
 0x13b   :  { %v244_v41 = vmax.f32 %v228_v38, %v932_v29  ;;  %v980_v38 = vld [vmem:[%s1165_s2 + $0x48] sm:$0xff] }
 0x13c   :  { %v213_v43 = vpop.trf.xlu0 }
 0x13d   :  { %v229_v44 = vsub.f32 1.0, %v213_v43  ;;  %266 = vperm.xlu1 %709, %v244_v41  }
 0x13f   :  { %v245_v45 = vmax.f32 %v229_v44, %v938_v42 }
 0x140   :  { %v214_v47 = vpop.trf.xlu0 }
 0x141   :  { %v230_v48 = vsub.f32 1.0, %v214_v47  ;;  %271 = vperm.xlu1 %709, %v245_v45   ;;  %v986_v45 = vld [vmem:[%s1165_s2 + $0x50] sm:$0xff] }
 0x143   :  { %v246_v49 = vmax.f32 %v230_v48, %v944_v46 }
 0x144   :  { %v215_v51 = vpop.trf.xlu0 }
 0x145   :  { %v231_v52 = vsub.f32 1.0, %v215_v51  ;;  %276 = vperm.xlu1 %709, %v246_v49   ;;  %v992_v51 = vld [vmem:[%s1165_s2 + $0x58] sm:$0xff] }
 0x147   :  { %v247_v61 = vmax.f32 %v231_v52, %v950_v50 }
 0x148   :  { %v216_v55 = vpop.trf.xlu0 }
 0x149   :  { %v232_v56 = vsub.f32 1.0, %v216_v55  ;;  %289 = vperm.xlu1 %709, %v247_v61  }
 0x14b   :  { %v248_v57 = vmax.f32 %v232_v56, %v956_v62  ;;  %v998_v56 = vld [vmem:[%s1165_s2 + $0x60] sm:$0xff] }
 0x14c   :  { %v217_v59 = vpop.trf.xlu0 }
 0x14d   :  { %v233_v60 = vsub.f32 1.0, %v217_v59  ;;  %294 = vperm.xlu1 %709, %v248_v57  }
 0x14f   :  { %v249_v17 = vmax.f32 %v233_v60, %v962_v58 }
 0x150   :  { %v218_v63 = vpop.trf.xlu0 }
 0x151   :  { %v234_v0 = vsub.f32 1.0, %v218_v63  ;;  %299 = vperm.xlu1 %709, %v249_v17   ;;  %v1004_v17 = vld [vmem:[%s1165_s2 + $0x68] sm:$0xff] }
 0x153   :  { %v250_v19 = vmax.f32 %v234_v0, %v968_v18 }
 0x154   :  { %v219_v22 = vpop.trf.xlu0 }
 0x155   :  { %v235_v28 = vsub.f32 1.0, %v219_v22  ;;  %304 = vperm.xlu1 %709, %v250_v19   ;;  %v1010_v22 = vld [vmem:[%s1165_s2 + $0x70] sm:$0xff] }
 0x157   :  { %v251_v37 = vmax.f32 %v235_v28, %v974_v21 }
 0x158   :  { %v220_v41 = vpop.trf.xlu0 }
 0x159   :  { %v236_v43 = vsub.f32 1.0, %v220_v41  ;;  %321 = vperm.xlu0 %708, %v251_v37  }
 0x15b   :  { %v252_v44 = vmax.f32 %v236_v43, %v980_v38  ;;  %v1016_v43 = vld [vmem:[%s1165_s2 + $0x78] sm:$0xff] }
 0x15c   :  { %v221_v47 = vpop.trf.xlu0 }
 0x15d   :  { %v237_v48 = vsub.f32 1.0, %v221_v47  ;;  %326 = vperm.xlu1 %709, %v252_v44  }
 0x15f   :  { %v253_v49 = vmax.f32 %v237_v48, %v986_v45 }
 0x160   :  { %v222_v52 = vpop.trf.xlu0 }
 0x161   :  { %v238_v61 = vsub.f32 1.0, %v222_v52  ;;  %331 = vperm.xlu1 %709, %v253_v49  }
 0x163   :  { %v254_v55 = vmax.f32 %v238_v61, %v992_v51 }
 0x164   :  { %v223_v57 = vpop.trf.xlu0 }
 0x165   :  { %v239_v59 = vsub.f32 1.0, %v223_v57  ;;  %336 = vperm.xlu1 %709, %v254_v55  }
 0x167   :  { %v255_v60 = vmax.f32 %v239_v59, %v998_v56 }
 0x168   :  { %v224_v63 = vpop.trf.xlu0 }
 0x169   :  { %v240_v0 = vsub.f32 1.0, %v224_v63  ;;  %353 = vperm.xlu1 %709, %v255_v60  }
 0x16b   :  { %v256_v19 = vmax.f32 %v240_v0, %v1004_v17 }
 0x16c   :  { %v225_v28 = vpop.trf.xlu0 }
 0x16d   :  { %v241_v37 = vsub.f32 1.0, %v225_v28  ;;  %358 = vperm.xlu1 %709, %v256_v19  }
 0x16f   :  { %v257_v41 = vmax.f32 %v241_v37, %v1010_v22 }
 0x170   :  { %v226_v44 = vpop.trf.xlu0 }
 0x171   :  { %v242_v47 = vsub.f32 1.0, %v226_v44  ;;  %363 = vperm.xlu1 %709, %v257_v41  }
 0x173   :  { %v258_v48 = vmax.f32 %v242_v47, %v1016_v43 }
 0x175   :  { %368 = vperm.xlu1 %709, %v258_v48  }
 0x1b8   :  { %v262_v49 = vpop.permute.xlu1 %261 }
 0x1b9   :  { %v279_v11 = vmul.f32 %v262_v49, %v830_v25 }
 0x1bc   :  { %v267_v52 = vpop.permute.xlu1 %266 }
 0x1bd   :  { %v280_v13 = vmul.f32 %v267_v52, %v845_v30 }
 0x1c0   :  { %v272_v61 = vpop.permute.xlu1 %271 }
 0x1c1   :  { %v281_v12 = vmul.f32 %v272_v61, %v860_v33 }
 0x1c3   :  { %v285_v3 = vsub.f32 1.0, %v281_v12 }
 0x1c4   :  { %v277_v55 = vpop.permute.xlu1 %276 }
 0x1c5   :  { %v282_v9 = vmul.f32 %v277_v55, %v875_v36  ;;  %v283_v55 = vsub.f32 1.0, %v279_v11 }
 0x1c8   :  { %v290_v57 = vpop.permute.xlu1 %289 }
 0x1c9   :  { %v307_v41 = vmul.f32 %v290_v57, %v840_v27 }
 0x1cb   :  { %v311_v7 = vsub.f32 1.0, %v307_v41 }
 0x1cc   :  { %v295_v59 = vpop.permute.xlu1 %294 }
 0x1cd   :  { %v308_v15 = vmul.f32 %v295_v59, %v835_v26  ;;  %v315_v2 = vmul.f32 %v311_v7, %v283_v55 }
 0x1cf   :  { %v312_v10 = vsub.f32 1.0, %v308_v15 }
 0x1d0   :  { %v300_v60 = vpop.permute.xlu1 %299 }
 0x1d1   :  { %v309_v44 = vmul.f32 %v300_v60, %v855_v32 }
 0x1d3   :  { %v313_v8 = vsub.f32 1.0, %v309_v44 }
 0x1d4   :  { %v305_v63 = vpop.permute.xlu1 %304 }
 0x1d5   :  { %v310_v47 = vmul.f32 %v305_v63, %v850_v31 }
 0x1d7   :  { %v314_v52 = vsub.f32 1.0, %v310_v47 }
 0x1d8   :  { %v322_v16 = vpop.permute.xlu0 %321 }
 0x1d9   :  { %v339_v59 = vmul.f32 %v322_v16, %v870_v35  ;;  %v286_v16 = vsub.f32 1.0, %v282_v9 }
 0x1db   :  { %v343_v15 = vsub.f32 1.0, %v339_v59  ;;  %v318_v41 = vmul.f32 %v314_v52, %v286_v16 }
 0x1dc   :  { %v327_v0 = vpop.permute.xlu1 %326 }
 0x1dd   :  { %v340_v14 = vmul.f32 %v327_v0, %v865_v34  ;;  %v284_v0 = vsub.f32 1.0, %v280_v13 }
 0x1df   :  { %v344_v6 = vsub.f32 1.0, %v340_v14  ;;  %v316_v1 = vmul.f32 %v312_v10, %v284_v0 }
 0x1e0   :  { %v332_v19 = vpop.permute.xlu1 %331 }
 0x1e1   :  { %v341_v57 = vmul.f32 %v332_v19, %v887_v40  ;;  %v348_v47 = vmul.f32 %v344_v6, %v316_v1 }
 0x1e3   :  { %v345_v19 = vsub.f32 1.0, %v341_v57 }
 0x1e4   :  { %v337_v28 = vpop.permute.xlu1 %336 }
 0x1e5   :  { %v342_v60 = vmul.f32 %v337_v28, %v882_v39 }
 0x1e7   :  { %v346_v4 = vsub.f32 1.0, %v342_v60 }
 0x1e8   :  { %v354_v37 = vpop.permute.xlu1 %353 }
 0x1e9   :  { %v371_v49 = vmul.f32 %v354_v37, %v907_v54  ;;  %v347_v37 = vmul.f32 %v343_v15, %v315_v2 }
 0x1ec   :  { %v359_v48 = vpop.permute.xlu1 %358 }
 0x1ed   :  { %v372_v63 = vmul.f32 %v359_v48, %v902_v53  ;;  %v317_v48 = vmul.f32 %v313_v8, %v285_v3  ;;  %v375_v53 = vsub.f32 1.0, %v371_v49 }
 0x1ef   :  { %v376_v28 = vsub.f32 1.0, %v372_v63  ;;  %v349_v54 = vmul.f32 %v345_v19, %v317_v48  ;;  %v379_v9 = vmul.f32 %v375_v53, %v347_v37 }
 0x1f0   :  { %v364_v5 = vpop.permute.xlu1 %363 }
 0x1f1   :  { %v373_v61 = vmul.f32 %v364_v5, %v919_v24  ;;  %v350_v5 = vmul.f32 %v346_v4, %v318_v41  ;;  %v380_v11 = vmul.f32 %v376_v28, %v348_v47 }
 0x1f3   :  { %v377_v13 = vsub.f32 1.0, %v373_v61  ;;  %v383_v57 = vmul.f32 %v380_v11, %v379_v9 }
 0x1f4   :  { %v369_v44 = vpop.permute.xlu1 %368 }
 0x1f5   :  { %v374_v14 = vmul.f32 %v369_v44, %v914_v23  ;;  %v381_v59 = vmul.f32 %v377_v13, %v349_v54 }
 0x1f7   :  { %v378_v12 = vsub.f32 1.0, %v374_v14 }
 0x1f9   :  { %v382_v10 = vmul.f32 %v378_v12, %v350_v5 }
 0x1fb   :  { %v384_v60 = vmul.f32 %v382_v10, %v381_v59 }
 0x1fd   :  { %v385_v63 = vmul.f32 %v384_v60, %v383_v57 }
 0x1ff   :  { %v386_v7 = vrot.slane %v385_v63, 7 }
 0x201   :  { %v387_v3 = vmul.f32 %v386_v7, %v385_v63 }
 0x203   :  { %v388_v8 = vrot.slane %v387_v3, 6 }
 0x205   :  { %v389_v52 = vmul.f32 %v388_v8, %v387_v3 }
 0x207   :  { %v390_v1 = vrot.slane %v389_v52, 4 }
 0x209   :  { %v391_v6 = vmul.f32 %v390_v1, %v389_v52 }
 0x20b   :  { %392 = vxpose.xlu1.b32.start.end [1/1] (short) %v391_v6, 128 }
 0x28b   :  { %v408_v0 = vpop.trf.xlu1 }
 0x28c   :  { %v424_v49 = vsub.f32 1.0, %v408_v0 }
 0x28e   :  { %v440_v2 = vmax.f32 %v424_v49, %v926_v20 }
 0x28f   :  { %v409_v4 = vpop.trf.xlu1 }
 0x290   :  { %v425_v61 = vsub.f32 1.0, %v409_v4  ;;  %458 = vperm.xlu1 %709, %v440_v2  }
 0x292   :  { %v441_v53 = vmax.f32 %v425_v61, %v932_v29 }
 0x293   :  { %v410_v54 = vpop.trf.xlu1 }
 0x294   :  { %v426_v55 = vsub.f32 1.0, %v410_v54  ;;  %463 = vperm.xlu0 %708, %v441_v53  }
 0x296   :  { %v442_v16 = vmax.f32 %v426_v55, %v938_v42 }
 0x297   :  { %v411_v15 = vpop.trf.xlu1 }
 0x298   :  { %v427_v19 = vsub.f32 1.0, %v411_v15  ;;  %468 = vperm.xlu0 %708, %v442_v16  }
 0x29a   :  { %v443_v28 = vmax.f32 %v427_v19, %v944_v46 }
 0x29b   :  { %v412_v48 = vpop.trf.xlu1 }
 0x29c   :  { %v428_v41 = vsub.f32 1.0, %v412_v48  ;;  %473 = vperm.xlu0 %708, %v443_v28  }
 0x29e   :  { %v444_v44 = vmax.f32 %v428_v41, %v950_v50 }
 0x29f   :  { %v413_v47 = vpop.trf.xlu1 }
 0x2a0   :  { %v429_v13 = vsub.f32 1.0, %v413_v47  ;;  %486 = vperm.xlu0 %708, %v444_v44  }
 0x2a2   :  { %v445_v14 = vmax.f32 %v429_v13, %v956_v62 }
 0x2a3   :  { %v414_v37 = vpop.trf.xlu1 }
 0x2a4   :  { %v430_v5 = vsub.f32 1.0, %v414_v37  ;;  %491 = vperm.xlu0 %708, %v445_v14  }
 0x2a6   :  { %v446_v11 = vmax.f32 %v430_v5, %v962_v58 }
 0x2a7   :  { %v415_v12 = vpop.trf.xlu1 }
 0x2a8   :  { %v431_v9 = vsub.f32 1.0, %v415_v12  ;;  %496 = vperm.xlu0 %708, %v446_v11  }
 0x2aa   :  { %v447_v59 = vmax.f32 %v431_v9, %v968_v18 }
 0x2ab   :  { %v416_v10 = vpop.trf.xlu1 }
 0x2ac   :  { %v432_v57 = vsub.f32 1.0, %v416_v10  ;;  %501 = vperm.xlu0 %708, %v447_v59  }
 0x2ae   :  { %v448_v60 = vmax.f32 %v432_v57, %v974_v21 }
 0x2af   :  { %v417_v63 = vpop.trf.xlu1 }
 0x2b0   :  { %v433_v7 = vsub.f32 1.0, %v417_v63  ;;  %518 = vperm.xlu0 %708, %v448_v60  }
 0x2b2   :  { %v449_v3 = vmax.f32 %v433_v7, %v980_v38 }
 0x2b3   :  { %v418_v8 = vpop.trf.xlu1 }
 0x2b4   :  { %v434_v52 = vsub.f32 1.0, %v418_v8  ;;  %523 = vperm.xlu0 %708, %v449_v3  }
 0x2b6   :  { %v450_v1 = vmax.f32 %v434_v52, %v986_v45 }
 0x2b7   :  { %v419_v6 = vpop.trf.xlu1 }
 0x2b8   :  { %v435_v0 = vsub.f32 1.0, %v419_v6  ;;  %528 = vperm.xlu0 %708, %v450_v1  }
 0x2ba   :  { %v451_v49 = vmax.f32 %v435_v0, %v992_v51 }
 0x2bb   :  { %v420_v2 = vpop.trf.xlu1 }
 0x2bc   :  { %v436_v4 = vsub.f32 1.0, %v420_v2  ;;  %533 = vperm.xlu0 %708, %v451_v49  }
 0x2be   :  { %v452_v61 = vmax.f32 %v436_v4, %v998_v56 }
 0x2bf   :  { %v421_v53 = vpop.trf.xlu1 }
 0x2c0   :  { %v437_v54 = vsub.f32 1.0, %v421_v53  ;;  %550 = vperm.xlu0 %708, %v452_v61   ;;  %v1203_v61 = vld [vmem:[#allocation18_spill] sm:$0xff] }
 0x2c2   :  { %v453_v55 = vmax.f32 %v437_v54, %v1004_v17 }
 0x2c3   :  { %v422_v16 = vpop.trf.xlu1 }
 0x2c4   :  { %v438_v15 = vsub.f32 1.0, %v422_v16  ;;  %555 = vperm.xlu0 %708, %v453_v55  }
 0x2c6   :  { %v454_v19 = vmax.f32 %v438_v15, %v1010_v22 }
 0x2c7   :  { %v423_v28 = vpop.trf.xlu1 }
 0x2c8   :  { %v439_v48 = vsub.f32 1.0, %v423_v28  ;;  %560 = vperm.xlu0 %708, %v454_v19  }
 0x2ca   :  { %v455_v41 = vmax.f32 %v439_v48, %v1016_v43 }
 0x2cc   :  { %565 = vperm.xlu0 %708, %v455_v41  }
 0x30f   :  { %v459_v60 = vpop.permute.xlu1 %458 }
 0x310   :  { %v476_v0 = vmul.f32 %v459_v60, %v830_v25  ;;  %v1204_v25 = vld [vmem:[#allocation19_spill] sm:$0xff] }
 0x313   :  { %v464_v44 = vpop.permute.xlu0 %463 }
 0x314   :  { %v477_v1 = vmul.f32 %v464_v44, %v845_v30 }
 0x317   :  { %v469_v47 = vpop.permute.xlu0 %468 }
 0x318   :  { %v478_v49 = vmul.f32 %v469_v47, %v860_v33 }
 0x31a   :  { %v482_v19 = vsub.f32 1.0, %v478_v49 }
 0x31b   :  { %v474_v13 = vpop.permute.xlu0 %473 }
 0x31c   :  { %v479_v2 = vmul.f32 %v474_v13, %v875_v36  ;;  %v480_v36 = vsub.f32 1.0, %v476_v0 }
 0x31f   :  { %v487_v14 = vpop.permute.xlu0 %486 }
 0x320   :  { %v504_v7 = vmul.f32 %v487_v14, %v840_v27 }
 0x322   :  { %v508_v53 = vsub.f32 1.0, %v504_v7 }
 0x323   :  { %v492_v37 = vpop.permute.xlu0 %491 }
 0x324   :  { %v505_v63 = vmul.f32 %v492_v37, %v835_v26  ;;  %v512_v44 = vmul.f32 %v508_v53, %v480_v36  ;;  %v1207_v36 = vld [vmem:[#allocation2_spill] sm:$0xff] }
 0x326   :  { %v509_v26 = vsub.f32 1.0, %v505_v63 }
 0x327   :  { %v497_v5 = vpop.permute.xlu0 %496 }
 0x328   :  { %v506_v3 = vmul.f32 %v497_v5, %v855_v32 }
 0x32a   :  { %v510_v54 = vsub.f32 1.0, %v506_v3 }
 0x32b   :  { %v502_v11 = vpop.permute.xlu0 %501 }
 0x32c   :  { %v507_v8 = vmul.f32 %v502_v11, %v850_v31  ;;  %v514_v47 = vmul.f32 %v510_v54, %v482_v19 }
 0x32e   :  { %v511_v30 = vsub.f32 1.0, %v507_v8 }
 0x32f   :  { %v519_v12 = vpop.permute.xlu0 %518 }
 0x330   :  { %v536_v4 = vmul.f32 %v519_v12, %v870_v35  ;;  %v483_v35 = vsub.f32 1.0, %v479_v2 }
 0x332   :  { %v540_v28 = vsub.f32 1.0, %v536_v4  ;;  %v515_v13 = vmul.f32 %v511_v30, %v483_v35 }
 0x333   :  { %v524_v9 = vpop.permute.xlu0 %523 }
 0x334   :  { %v537_v6 = vmul.f32 %v524_v9, %v865_v34  ;;  %v481_v34 = vsub.f32 1.0, %v477_v1  ;;  %v544_v9 = vmul.f32 %v540_v28, %v512_v44 }
 0x336   :  { %v541_v16 = vsub.f32 1.0, %v537_v6  ;;  %v513_v48 = vmul.f32 %v509_v26, %v481_v34  ;;  %v1206_v34 = vld [vmem:[#allocation5_spill] sm:$0xff] }
 0x337   :  { %v529_v59 = vpop.permute.xlu0 %528 }
 0x338   :  { %v538_v27 = vmul.f32 %v529_v59, %v887_v40  ;;  %v545_v37 = vmul.f32 %v541_v16, %v513_v48 }
 0x33a   :  { %v542_v40 = vsub.f32 1.0, %v538_v27 }
 0x33b   :  { %v534_v10 = vpop.permute.xlu0 %533 }
 0x33c   :  { %v539_v32 = vmul.f32 %v534_v10, %v882_v39  ;;  %v546_v59 = vmul.f32 %v542_v40, %v514_v47  ;;  %v1208_v40 = vld [vmem:[#allocation4_spill] sm:$0xff] }
 0x33e   :  { %v543_v41 = vsub.f32 1.0, %v539_v32 }
 0x33f   :  { %v551_v57 = vpop.permute.xlu0 %550 }
 0x340   :  { %v568_v15 = vmul.f32 %v551_v57, %v1204_v25 }
 0x342   :  { %v572_v5 = vsub.f32 1.0, %v568_v15 }
 0x343   :  { %v556_v52 = vpop.permute.xlu0 %555 }
 0x344   :  { %v569_v31 = vmul.f32 %v556_v52, %v1203_v61  ;;  %v576_v60 = vmul.f32 %v572_v5, %v544_v9  ;;  %v1205_v61 = vld [vmem:[#allocation3_spill] sm:$0xff] }
 0x346   :  { %v573_v39 = vsub.f32 1.0, %v569_v31 }
 0x347   :  { %v561_v55 = vpop.permute.xlu0 %560 }
 0x348   :  { %v570_v33 = vmul.f32 %v561_v55, %v919_v24  ;;  %v547_v24 = vmul.f32 %v543_v41, %v515_v13  ;;  %v577_v10 = vmul.f32 %v573_v39, %v545_v37  ;;  %v1209_v13 = vld [vmem:[#allocation7_spill] sm:$0xff] }
 0x34a   :  { %v574_v11 = vsub.f32 1.0, %v570_v33  ;;  %v580_v3 = vmul.f32 %v577_v10, %v576_v60 }
 0x34b   :  { %v566_v14 = vpop.permute.xlu0 %565 }
 0x34c   :  { %v571_v12 = vmul.f32 %v566_v14, %v914_v23  ;;  %v578_v63 = vmul.f32 %v574_v11, %v546_v59 }
 0x34e   :  { %v575_v57 = vsub.f32 1.0, %v571_v12  ;;  %v1210_v12 = vld [vmem:[#allocation6_spill] sm:$0xff] }
 0x350   :  { %v579_v7 = vmul.f32 %v575_v57, %v547_v24  ;;  %v1211_v57 = vld [vmem:[#allocation9_spill] sm:$0xff] }
 0x352   :  { %v581_v8 = vmul.f32 %v579_v7, %v578_v63 }
 0x354   :  { %v582_v52 = vmul.f32 %v581_v8, %v580_v3  ;;  %v1212_v8 = vld [vmem:[#allocation8_spill] sm:$0xff] }
 0x356   :  { %v583_v1 = vrot.slane %v582_v52, 7 }
 0x358   :  { %v584_v6 = vmul.f32 %v583_v1, %v582_v52 }
 0x35a   :  { %v585_v0 = vrot.slane %v584_v6, 6 }
 0x35c   :  { %v586_v49 = vmul.f32 %v585_v0, %v584_v6 }
 0x35e   :  { %v587_v2 = vrot.slane %v586_v49, 4 }
 0x360   :  { %v588_v4 = vmul.f32 %v587_v2, %v586_v49  ;;  %v1213_v49 = vld [vmem:[#allocation11_spill] sm:$0xff] }
 0x362   :  { %589 = vxpose.xlu0.b32.start.end [1/1] (short) %v588_v4, 128 }
 0x3e2   :  { %v605_v26 = vpop.trf.xlu0 }
 0x3e3   :  { %v621_v23 = vsub.f32 1.0, %v605_v26 }
 0x3e5   :  { %v637_v27 = vmax.f32 %v621_v23, %v926_v20 }
 0x3e6   :  { %v606_v32 = vpop.trf.xlu0 }
 0x3e7   :  { %v653_v31 = vadd.f32 %v637_v27, %v1205_v61  ;;  %v622_v53 = vsub.f32 1.0, %v606_v32  ;;  %v1214_v27 = vld [vmem:[#allocation10_spill] sm:$0xff] }
 0x3e9   :  { %v669_v54 = vmul.f32 0.5, %v653_v31  ;;  %v638_v30 = vmax.f32 %v622_v53, %v932_v29 }
 0x3ea   :  { %v607_v55 = vpop.trf.xlu0 }
 0x3eb   :  { %686 = vst.msk [vmem:[%s1166_s3] sm:$0xff] %vm685_vm0, %v669_v54  ;;  %v654_v16 = vadd.f32 %v638_v30, %v1206_v34  ;;  %v623_v25 = vsub.f32 1.0, %v607_v55  ;;  %v1215_v54 = vld [vmem:[#allocation13_spill] sm:$0xff] }
 0x3ed   :  { %v670_v15 = vmul.f32 0.5, %v654_v16  ;;  %v639_v20 = vmax.f32 %v623_v25, %v938_v42  ;;  %v1216_v25 = vld [vmem:[#allocation12_spill] sm:$0xff] }
 0x3ee   :  { %v608_v33 = vpop.trf.xlu0 }
 0x3ef   :  { %687 = vst.msk [vmem:[%s1166_s3 + $0x8] sm:$0xff] %vm685_vm0, %v670_v15  ;;  %v655_v29 = vadd.f32 %v639_v20, %v1207_v36  ;;  %v624_v19 = vsub.f32 1.0, %v608_v33 }
 0x3f1   :  { %v671_v35 = vmul.f32 0.5, %v655_v29  ;;  %v640_v28 = vmax.f32 %v624_v19, %v944_v46  ;;  %v1217_v29 = vld [vmem:[#allocation15_spill] sm:$0xff] }
 0x3f2   :  { %v609_v48 = vpop.trf.xlu0 }
 0x3f3   :  { %688 = vst.msk [vmem:[%s1166_s3 + $0x10] sm:$0xff] %vm685_vm0, %v671_v35  ;;  %v656_v42 = vadd.f32 %v640_v28, %v1208_v40  ;;  %v625_v41 = vsub.f32 1.0, %v609_v48  ;;  %v1218_v40 = vld [vmem:[#allocation14_spill] sm:$0xff] }
 0x3f5   :  { %v672_v39 = vmul.f32 0.5, %v656_v42  ;;  %v641_v44 = vmax.f32 %v625_v41, %v950_v50 }
 0x3f6   :  { %v610_v47 = vpop.trf.xlu0 }
 0x3f7   :  { %689 = vst.msk [vmem:[%s1166_s3 + $0x18] sm:$0xff] %vm685_vm0, %v672_v39  ;;  %v657_v46 = vadd.f32 %v641_v44, %v1209_v13  ;;  %v626_v14 = vsub.f32 1.0, %v610_v47  ;;  %v1219_v47 = vld [vmem:[#allocation17_spill] sm:$0xff] }
 0x3f9   :  { %v673_v37 = vmul.f32 0.5, %v657_v46  ;;  %v642_v5 = vmax.f32 %v626_v14, %v956_v62 }
 0x3fa   :  { %v611_v11 = vpop.trf.xlu0 }
 0x3fb   :  { %690 = vst.msk [vmem:[%s1166_s3 + $0x20] sm:$0xff] %vm685_vm0, %v673_v37  ;;  %v658_v50 = vadd.f32 %v642_v5, %v1210_v12  ;;  %v627_v9 = vsub.f32 1.0, %v611_v11  ;;  %v1220_v37 = vld [vmem:[#allocation16_spill] sm:$0xff] }
 0x3fd   :  { %v674_v59 = vmul.f32 0.5, %v658_v50  ;;  %v643_v24 = vmax.f32 %v627_v9, %v962_v58 }
 0x3fe   :  { %v612_v10 = vpop.trf.xlu0 }
 0x3ff   :  { %691 = vst.msk [vmem:[%s1166_s3 + $0x28] sm:$0xff] %vm685_vm0, %v674_v59  ;;  %v659_v62 = vadd.f32 %v643_v24, %v1211_v57  ;;  %v628_v60 = vsub.f32 1.0, %v612_v10 }
 0x401   :  { %v675_v63 = vmul.f32 0.5, %v659_v62  ;;  %v644_v7 = vmax.f32 %v628_v60, %v968_v18 }
 0x402   :  { %v613_v3 = vpop.trf.xlu0 }
 0x403   :  { %692 = vst.msk [vmem:[%s1166_s3 + $0x30] sm:$0xff] %vm685_vm0, %v675_v63  ;;  %v660_v58 = vadd.f32 %v644_v7, %v1212_v8  ;;  %v629_v52 = vsub.f32 1.0, %v613_v3 }
 0x405   :  { %v676_v1 = vmul.f32 0.5, %v660_v58  ;;  %v645_v6 = vmax.f32 %v629_v52, %v974_v21 }
 0x406   :  { %v614_v0 = vpop.trf.xlu0 }
 0x407   :  { %693 = vst.msk [vmem:[%s1166_s3 + $0x38] sm:$0xff] %vm685_vm0, %v676_v1  ;;  %v661_v18 = vadd.f32 %v645_v6, %v1213_v49  ;;  %v630_v2 = vsub.f32 1.0, %v614_v0 }
 0x409   :  { %v677_v4 = vmul.f32 0.5, %v661_v18  ;;  %v646_v26 = vmax.f32 %v630_v2, %v980_v38 }
 0x40a   :  { %v615_v23 = vpop.trf.xlu0 }
 0x40b   :  { %694 = vst.msk [vmem:[%s1166_s3 + $0x40] sm:$0xff] %vm685_vm0, %v677_v4  ;;  %v662_v21 = vadd.f32 %v646_v26, %v1214_v27  ;;  %v631_v32 = vsub.f32 1.0, %v615_v23 }
 0x40d   :  { %v678_v61 = vmul.f32 0.5, %v662_v21  ;;  %v647_v31 = vmax.f32 %v631_v32, %v986_v45 }
 0x40e   :  { %v616_v53 = vpop.trf.xlu0 }
 0x40f   :  { %695 = vst.msk [vmem:[%s1166_s3 + $0x48] sm:$0xff] %vm685_vm0, %v678_v61  ;;  %v663_v38 = vadd.f32 %v647_v31, %v1215_v54  ;;  %v632_v30 = vsub.f32 1.0, %v616_v53 }
 0x411   :  { %v679_v55 = vmul.f32 0.5, %v663_v38  ;;  %v648_v34 = vmax.f32 %v632_v30, %v992_v51 }
 0x412   :  { %v617_v16 = vpop.trf.xlu0 }
 0x413   :  { %696 = vst.msk [vmem:[%s1166_s3 + $0x50] sm:$0xff] %vm685_vm0, %v679_v55  ;;  %v664_v45 = vadd.f32 %v648_v34, %v1216_v25  ;;  %v633_v15 = vsub.f32 1.0, %v617_v16 }
 0x415   :  { %v680_v20 = vmul.f32 0.5, %v664_v45  ;;  %v649_v33 = vmax.f32 %v633_v15, %v998_v56 }
 0x416   :  { %v618_v36 = vpop.trf.xlu0 }
 0x417   :  { %697 = vst.msk [vmem:[%s1166_s3 + $0x58] sm:$0xff] %vm685_vm0, %v680_v20  ;;  %v665_v51 = vadd.f32 %v649_v33, %v1217_v29  ;;  %v634_v19 = vsub.f32 1.0, %v618_v36 }
 0x419   :  { %v681_v35 = vmul.f32 0.5, %v665_v51  ;;  %v650_v28 = vmax.f32 %v634_v19, %v1004_v17 }
 0x41a   :  { %v619_v48 = vpop.trf.xlu0 }
 0x41b   :  { %698 = vst.msk [vmem:[%s1166_s3 + $0x60] sm:$0xff] %vm685_vm0, %v681_v35  ;;  %v666_v56 = vadd.f32 %v650_v28, %v1218_v40  ;;  %v635_v42 = vsub.f32 1.0, %v619_v48 }
 0x41d   :  { %v682_v41 = vmul.f32 0.5, %v666_v56  ;;  %v651_v39 = vmax.f32 %v635_v42, %v1010_v22 }
 0x41e   :  { %v620_v44 = vpop.trf.xlu0 }
 0x41f   :  { %699 = vst.msk [vmem:[%s1166_s3 + $0x68] sm:$0xff] %vm685_vm0, %v682_v41  ;;  %v667_v17 = vadd.f32 %v651_v39, %v1219_v47  ;;  %v636_v13 = vsub.f32 1.0, %v620_v44 }
 0x421   :  { %v683_v46 = vmul.f32 0.5, %v667_v17  ;;  %v652_v14 = vmax.f32 %v636_v13, %v1016_v43 }
 0x423   :  { %700 = vst.msk [vmem:[%s1166_s3 + $0x70] sm:$0xff] %vm685_vm0, %v683_v46  ;;  %v668_v5 = vadd.f32 %v652_v14, %v1220_v37 }
 0x425   :  { %v684_v22 = vmul.f32 0.5, %v668_v5 }
 0x427   :  { %701 = vst.msk [vmem:[%s1166_s3 + $0x78] sm:$0xff] %vm685_vm0, %v684_v22 }

</bundles_post_ra>
